<compile_context>
chip_gen: v6e
topology: v6e:2x2x1
jax: 0.10.0
libtpu: 0.0.40
codegen_flags: <defaults>
</compile_context>

<pallas_src>
import functools

import jax
import jax.numpy as jnp
from jax import lax
from jax.experimental import pallas as pl
from jax.experimental.pallas import tpu as pltpu


# ---------------------------------------------------------------------------
# Fused Pallas kernel: conv1 -> BN1 -> ReLU -> conv2 -> BN2 -> +x -> ReLU
# ---------------------------------------------------------------------------
def _residual_block_kernel(x_ref, w1_ref, b1_ref, w2_ref, b2_ref, o_ref,
                           *, H, W, d1, d2, bt):
    HW = H * W
    C = o_ref.shape[1]

    # Column index of every flat pixel (p = y*W + x -> x), lane-dense (1, HW).
    if (W & (W - 1)) == 0:                                   # power-of-two width
        xcoord = lax.broadcasted_iota(jnp.int32, (1, HW), 1) & (W - 1)
    else:
        xcoord = lax.broadcasted_iota(jnp.int32, (H, W), 1).reshape(1, HW)

    def stacked_taps(img_bf, d):
        """img_bf: (C, HW) bf16 -> (9*C, HW) bf16 stacked taps (zero pad = d)."""
        m = d * W + d                                        # max |flat shift|
        z = jnp.zeros((C, m), img_bf.dtype)
        flat = jnp.concatenate([z, img_bf, z], axis=1)       # (C, HW + 2m)
        taps = []
        for ky in range(3):
            for kx in range(3):
                s = (ky - 1) * d * W + (kx - 1) * d
                tap = flat[:, m + s:m + s + HW]              # static lane slice
                dx = (kx - 1) * d                            # mask row-wrapped cols
                if dx < 0:
                    tap = jnp.where(xcoord >= -dx, tap, 0)
                elif dx > 0:
                    tap = jnp.where(xcoord < W - dx, tap, 0)
                taps.append(tap)
        return jnp.concatenate(taps, axis=0)                 # (9*C, HW)

    x_f32 = x_ref[...]                                       # (bt, C, HW) f32
    x_bf = x_f32.astype(jnp.bfloat16)

    # conv1 + folded BN1 + ReLU -- ONE matmul over all bt images.
    p1 = jnp.concatenate([stacked_taps(x_bf[b], d1) for b in range(bt)], axis=1)
    h1 = jnp.dot(w1_ref[...], p1, preferred_element_type=jnp.float32)    # (C, bt*HW)
    h1 = jnp.maximum(h1 + b1_ref[...], 0.0).astype(jnp.bfloat16)         # stays in VMEM

    # conv2 + folded BN2 -- ONE matmul.
    p2 = jnp.concatenate(
        [stacked_taps(h1[:, b * HW:(b + 1) * HW], d2) for b in range(bt)], axis=1)
    out = jnp.dot(w2_ref[...], p2, preferred_element_type=jnp.float32) + b2_ref[...]

    # residual (ORIGINAL f32 x) + ReLU; per-image lane-dense stores.
    for b in range(bt):
        o_ref[b] = jnp.maximum(out[:, b * HW:(b + 1) * HW] + x_f32[b], 0.0)


# ---------------------------------------------------------------------------
# Host-side glue: BN folding, tiling heuristics, pallas_call wrapper
# ---------------------------------------------------------------------------
def _fold_weight(w_oihw, gamma, var, eps=1e-5):
    """PyTorch (Cout,Cin,3,3) + BN scale -> (Cout, 9*Cin) bf16, tap-major K."""
    cout, cin, kh, kw = w_oihw.shape
    scale = gamma / jnp.sqrt(var + eps)                      # (Cout,)
    w = jnp.transpose(w_oihw, (0, 2, 3, 1)).reshape(cout, kh * kw * cin)
    return (w * scale[:, None]).astype(jnp.bfloat16)


def _fold_bias(gamma, beta, mean, var, eps=1e-5):
    scale = gamma / jnp.sqrt(var + eps)
    return (beta - mean * scale).reshape(-1, 1).astype(jnp.float32)      # (Cout, 1)


def _pick_batch_block(B, C, H, W):
    """Largest divisor of B that keeps >= 2 grid steps (both v7x cores busy),
    stopping once a step moves >= ~512 KiB (DMA-efficient)."""
    bytes_per_img = C * H * W * 8                            # f32 in + f32 out
    bt = 1
    for cand in range(1, B + 1):
        if B % cand == 0 and B // cand >= 2:
            bt = cand
            if cand * bytes_per_img >= 512 * 1024:
                break
    return bt


def _vmem_limit_bytes(bt, C, H, W):
    """VMEM budget from the actual working set, capped at ~65% of the
    hardware's VMEM (derived from get_tpu_info, not a hard-coded 48 MiB)."""
    hw = H * W
    io_block = bt * C * hw * 4 * 2                           # x + out blocks (f32)
    weights = 2 * (9 * C * C * 2 + C * 4)
    interm = bt * (2 * 9 * C * hw * 2 + 6 * C * hw * 4)      # taps (bf16) + acc/h1/slack
    est = 2 * io_block + weights + interm                    # x/out are double-buffered
    try:
        cap = getattr(pltpu.get_tpu_info(), "vmem_capacity_bytes", 64 * 1024 * 1024)
    except Exception:
        cap = 64 * 1024 * 1024                               # conservative (v7x physical)
    return int(min(max(4 * est, 16 * 1024 * 1024), (13 * cap) // 20))


def residual_block(x_nchw, params, *, dilation=(1, 1)):
    """ResidualBlock forward (stride=1, shortcut=None, eval-mode BN).
    NCHW f32 in / NCHW f32 out; the wrapper only does free reshapes."""
    B, C, H, W = x_nchw.shape
    d1, d2 = dilation
    HW = H * W

    x_flat = x_nchw.reshape(B, C, HW)                        # free, contiguous

    w1 = _fold_weight(params["w1"], params["g1"], params["v1"])
    w2 = _fold_weight(params["w2"], params["g2"], params["v2"])
    b1 = _fold_bias(params["g1"], params["be1"], params["m1"], params["v1"])
    b2 = _fold_bias(params["g2"], params["be2"], params["m2"], params["v2"])

    bt = _pick_batch_block(B, C, H, W)
    kernel = functools.partial(_residual_block_kernel, H=H, W=W, d1=d1, d2=d2, bt=bt)

    flops = 2 * B * 2 * HW * (9 * C) * C                     # 2 convs, 2 flops / MAC
    bytes_accessed = B * C * HW * 8 + 2 * 9 * C * C * 2 + 2 * C * 4

    out_flat = pl.pallas_call(
        kernel,
        out_shape=jax.ShapeDtypeStruct((B, C, HW), jnp.float32),
        grid=(B // bt,),
        in_specs=[
            pl.BlockSpec((bt, C, HW), lambda b: (b, 0, 0)),  # x tile (f32, lane-dense)
            pl.BlockSpec((C, 9 * C), lambda b: (0, 0)),      # folded w1 (resident)
            pl.BlockSpec((C, 1), lambda b: (0, 0)),          # folded bias1
            pl.BlockSpec((C, 9 * C), lambda b: (0, 0)),      # folded w2 (resident)
            pl.BlockSpec((C, 1), lambda b: (0, 0)),          # folded bias2
        ],
        out_specs=pl.BlockSpec((bt, C, HW), lambda b: (b, 0, 0)),
        compiler_params=pltpu.CompilerParams(
            dimension_semantics=("parallel",),
            vmem_limit_bytes=_vmem_limit_bytes(bt, C, H, W),
        ),
        cost_estimate=pl.CostEstimate(flops=flops, transcendentals=0,
                                      bytes_accessed=bytes_accessed),
    )(x_flat, w1, b1, w2, b2)

    return out_flat.reshape(B, C, H, W)


# ---------------------------------------------------------------------------
# Pure-JAX f32 reference (correctness check only)
# ---------------------------------------------------------------------------
def _ref_forward(x, params, eps=1e-5, dilation=(1, 1)):
    def conv(x, w, d):
        return lax.conv_general_dilated(
            x, w, window_strides=(1, 1), padding=[(d, d), (d, d)],
            rhs_dilation=(d, d), dimension_numbers=("NCHW", "OIHW", "NCHW"))

    def bn(x, g, b, m, v):
        sh = (1, -1, 1, 1)
        return (x - m.reshape(sh)) / jnp.sqrt(v.reshape(sh) + eps) * g.reshape(sh) + b.reshape(sh)

    h = jax.nn.relu(bn(conv(x, params["w1"], dilation[0]),
                       params["g1"], params["be1"], params["m1"], params["v1"]))
    o = bn(conv(h, params["w2"], dilation[1]),
           params["g2"], params["be2"], params["m2"], params["v2"]) + x
    return jax.nn.relu(o)


# ---------------------------------------------------------------------------
if __name__ == "__main__":
    key = jax.random.PRNGKey(0)
    B, C, H, W = 2, 4, 16, 16  # in_channels == out_channels (shortcut=None path)

    ks = jax.random.split(key, 11)
    x = jax.random.normal(ks[0], (B, C, H, W), jnp.float32)

    params = {
        "w1": 0.2 * jax.random.normal(ks[1], (C, C, 3, 3), jnp.float32),
        "w2": 0.2 * jax.random.normal(ks[2], (C, C, 3, 3), jnp.float32),
        # BatchNorm params (eval-mode / folded running stats)
        "g1": 1.0 + 0.1 * jax.random.normal(ks[3], (C,), jnp.float32),
        "be1": 0.1 * jax.random.normal(ks[4], (C,), jnp.float32),
        "m1": 0.1 * jax.random.normal(ks[5], (C,), jnp.float32),
        "v1": 0.5 + jax.random.uniform(ks[6], (C,), jnp.float32),
        "g2": 1.0 + 0.1 * jax.random.normal(ks[7], (C,), jnp.float32),
        "be2": 0.1 * jax.random.normal(ks[8], (C,), jnp.float32),
        "m2": 0.1 * jax.random.normal(ks[9], (C,), jnp.float32),
        "v2": 0.5 + jax.random.uniform(ks[10], (C,), jnp.float32),
    }

    run = jax.jit(functools.partial(residual_block, dilation=(1, 1)))
    out = jax.block_until_ready(run(x, params))

    ref = _ref_forward(x, params)
    assert out.shape == (B, C, H, W), out.shape
    max_err = float(jnp.max(jnp.abs(out - ref)))
    # bf16 MXU operands / bf16 h1 vs f32 reference (residual add is exact f32).
    assert jnp.allclose(out, ref, atol=1e-1, rtol=1e-1), f"max abs err {max_err}"

    print("KERNEL_OK")
</pallas_src>

<mosaic_0001>
module attributes {stable_mosaic.version = 11 : i64} {
  func.func @_residual_block_kernel(%arg0: i32, %arg1: memref<1x4x256xf32, #tpu.memory_space<vmem>>, %arg2: memref<4x36xbf16, #tpu.memory_space<vmem>>, %arg3: memref<4x1xf32, #tpu.memory_space<vmem>>, %arg4: memref<4x36xbf16, #tpu.memory_space<vmem>>, %arg5: memref<4x1xf32, #tpu.memory_space<vmem>>, %arg6: memref<1x4x256xf32, #tpu.memory_space<vmem>>) attributes {dimension_semantics = [#tpu.dimension_semantics<parallel>], iteration_bounds = array<i64: 2>, scalar_prefetch = 0 : i64, scratch_operands = 0 : i64, tpu.core_type = #tpu.core_type<tc>, window_params = [{transform_indices = @transform_0, window_bounds = array<i64: 1, 4, 256>}, {pipeline_mode = #tpu.pipeline_mode<synchronous>, transform_indices = @transform_1, window_bounds = array<i64: 4, 36>}, {pipeline_mode = #tpu.pipeline_mode<synchronous>, transform_indices = @transform_2, window_bounds = array<i64: 4, 1>}, {pipeline_mode = #tpu.pipeline_mode<synchronous>, transform_indices = @transform_3, window_bounds = array<i64: 4, 36>}, {pipeline_mode = #tpu.pipeline_mode<synchronous>, transform_indices = @transform_4, window_bounds = array<i64: 4, 1>}, {transform_indices = @transform_5, window_bounds = array<i64: 1, 4, 256>}]} {
    %0 = tpu.iota {dimensions = array<i32: 1>} : vector<1x256xi32>
    %c15_i32 = arith.constant 15 : i32
    %1 = vector.broadcast %c15_i32 : i32 to vector<1x256xi32>
    %2 = arith.andi %0, %1 : vector<1x256xi32>
    %c0 = arith.constant 0 : index
    %c0_0 = arith.constant 0 : index
    %c0_1 = arith.constant 0 : index
    %3 = vector.load %arg1[%c0, %c0_0, %c0_1] : memref<1x4x256xf32, #tpu.memory_space<vmem>>, vector<1x4x256xf32>
    %4 = arith.truncf %3 : vector<1x4x256xf32> to vector<1x4x256xbf16>
    %5 = vector.shape_cast %4 : vector<1x4x256xbf16> to vector<4x256xbf16>
    %cst = arith.constant 0.000000e+00 : bf16
    %6 = vector.broadcast %cst : bf16 to vector<4x17xbf16>
    %7 = tpu.concatenate %6, %5, %6 in 1 : vector<4x17xbf16>, vector<4x256xbf16>, vector<4x17xbf16> -> vector<4x290xbf16>
    %8 = vector.extract_strided_slice %7 {offsets = [0, 0], sizes = [4, 256], strides = [1, 1]} : vector<4x290xbf16> to vector<4x256xbf16>
    %c1_i32 = arith.constant 1 : i32
    %9 = vector.broadcast %c1_i32 : i32 to vector<1x256xi32>
    %10 = arith.cmpi sge, %2, %9 : vector<1x256xi32>
    %c0_i32 = arith.constant 0 : i32
    %11 = arith.sitofp %c0_i32 : i32 to bf16
    %12 = vector.shape_cast %10 : vector<1x256xi1> to vector<1x256xi1>
    %13 = vector.broadcast %12 : vector<1x256xi1> to vector<4x256xi1>
    %14 = vector.broadcast %11 : bf16 to vector<4x256xbf16>
    %15 = arith.select %13, %8, %14 : vector<4x256xi1>, vector<4x256xbf16>
    %16 = vector.extract_strided_slice %7 {offsets = [0, 1], sizes = [4, 256], strides = [1, 1]} : vector<4x290xbf16> to vector<4x256xbf16>
    %17 = vector.extract_strided_slice %7 {offsets = [0, 2], sizes = [4, 256], strides = [1, 1]} : vector<4x290xbf16> to vector<4x256xbf16>
    %c15_i32_2 = arith.constant 15 : i32
    %18 = vector.broadcast %c15_i32_2 : i32 to vector<1x256xi32>
    %19 = arith.cmpi slt, %2, %18 : vector<1x256xi32>
    %c0_i32_3 = arith.constant 0 : i32
    %20 = arith.sitofp %c0_i32_3 : i32 to bf16
    %21 = vector.shape_cast %19 : vector<1x256xi1> to vector<1x256xi1>
    %22 = vector.broadcast %21 : vector<1x256xi1> to vector<4x256xi1>
    %23 = vector.broadcast %20 : bf16 to vector<4x256xbf16>
    %24 = arith.select %22, %17, %23 : vector<4x256xi1>, vector<4x256xbf16>
    %25 = vector.extract_strided_slice %7 {offsets = [0, 16], sizes = [4, 256], strides = [1, 1]} : vector<4x290xbf16> to vector<4x256xbf16>
    %c1_i32_4 = arith.constant 1 : i32
    %26 = vector.broadcast %c1_i32_4 : i32 to vector<1x256xi32>
    %27 = arith.cmpi sge, %2, %26 : vector<1x256xi32>
    %c0_i32_5 = arith.constant 0 : i32
    %28 = arith.sitofp %c0_i32_5 : i32 to bf16
    %29 = vector.shape_cast %27 : vector<1x256xi1> to vector<1x256xi1>
    %30 = vector.broadcast %29 : vector<1x256xi1> to vector<4x256xi1>
    %31 = vector.broadcast %28 : bf16 to vector<4x256xbf16>
    %32 = arith.select %30, %25, %31 : vector<4x256xi1>, vector<4x256xbf16>
    %33 = vector.extract_strided_slice %7 {offsets = [0, 17], sizes = [4, 256], strides = [1, 1]} : vector<4x290xbf16> to vector<4x256xbf16>
    %34 = vector.extract_strided_slice %7 {offsets = [0, 18], sizes = [4, 256], strides = [1, 1]} : vector<4x290xbf16> to vector<4x256xbf16>
    %c15_i32_6 = arith.constant 15 : i32
    %35 = vector.broadcast %c15_i32_6 : i32 to vector<1x256xi32>
    %36 = arith.cmpi slt, %2, %35 : vector<1x256xi32>
    %c0_i32_7 = arith.constant 0 : i32
    %37 = arith.sitofp %c0_i32_7 : i32 to bf16
    %38 = vector.shape_cast %36 : vector<1x256xi1> to vector<1x256xi1>
    %39 = vector.broadcast %38 : vector<1x256xi1> to vector<4x256xi1>
    %40 = vector.broadcast %37 : bf16 to vector<4x256xbf16>
    %41 = arith.select %39, %34, %40 : vector<4x256xi1>, vector<4x256xbf16>
    %42 = vector.extract_strided_slice %7 {offsets = [0, 32], sizes = [4, 256], strides = [1, 1]} : vector<4x290xbf16> to vector<4x256xbf16>
    %c1_i32_8 = arith.constant 1 : i32
    %43 = vector.broadcast %c1_i32_8 : i32 to vector<1x256xi32>
    %44 = arith.cmpi sge, %2, %43 : vector<1x256xi32>
    %c0_i32_9 = arith.constant 0 : i32
    %45 = arith.sitofp %c0_i32_9 : i32 to bf16
    %46 = vector.shape_cast %44 : vector<1x256xi1> to vector<1x256xi1>
    %47 = vector.broadcast %46 : vector<1x256xi1> to vector<4x256xi1>
    %48 = vector.broadcast %45 : bf16 to vector<4x256xbf16>
    %49 = arith.select %47, %42, %48 : vector<4x256xi1>, vector<4x256xbf16>
    %50 = vector.extract_strided_slice %7 {offsets = [0, 33], sizes = [4, 256], strides = [1, 1]} : vector<4x290xbf16> to vector<4x256xbf16>
    %51 = vector.extract_strided_slice %7 {offsets = [0, 34], sizes = [4, 256], strides = [1, 1]} : vector<4x290xbf16> to vector<4x256xbf16>
    %c15_i32_10 = arith.constant 15 : i32
    %52 = vector.broadcast %c15_i32_10 : i32 to vector<1x256xi32>
    %53 = arith.cmpi slt, %2, %52 : vector<1x256xi32>
    %c0_i32_11 = arith.constant 0 : i32
    %54 = arith.sitofp %c0_i32_11 : i32 to bf16
    %55 = vector.shape_cast %53 : vector<1x256xi1> to vector<1x256xi1>
    %56 = vector.broadcast %55 : vector<1x256xi1> to vector<4x256xi1>
    %57 = vector.broadcast %54 : bf16 to vector<4x256xbf16>
    %58 = arith.select %56, %51, %57 : vector<4x256xi1>, vector<4x256xbf16>
    %59 = tpu.concatenate %15, %16, %24, %32, %33, %41, %49, %50, %58 in 0 : vector<4x256xbf16>, vector<4x256xbf16>, vector<4x256xbf16>, vector<4x256xbf16>, vector<4x256xbf16>, vector<4x256xbf16>, vector<4x256xbf16>, vector<4x256xbf16>, vector<4x256xbf16> -> vector<36x256xbf16>
    %c0_12 = arith.constant 0 : index
    %c0_13 = arith.constant 0 : index
    %60 = vector.load %arg2[%c0_12, %c0_13] : memref<4x36xbf16, #tpu.memory_space<vmem>>, vector<4x36xbf16>
    %cst_14 = arith.constant dense<0.000000e+00> : vector<4x256xf32>
    %61 = tpu.matmul %60, %59, %cst_14 {dimension_numbers = #tpu.dot_dimension_numbers<[1], [0], [0], [1], [0, 0, 1, 1], [], []>} : vector<4x36xbf16>, vector<36x256xbf16>, vector<4x256xf32> -> vector<4x256xf32>
    %c0_15 = arith.constant 0 : index
    %c0_16 = arith.constant 0 : index
    %62 = vector.load %arg3[%c0_15, %c0_16] : memref<4x1xf32, #tpu.memory_space<vmem>>, vector<4x1xf32>
    %63 = vector.broadcast %62 : vector<4x1xf32> to vector<4x256xf32>
    %64 = arith.addf %61, %63 : vector<4x256xf32>
    %cst_17 = arith.constant 0.000000e+00 : f32
    %65 = vector.broadcast %cst_17 : f32 to vector<4x256xf32>
    %66 = arith.maximumf %64, %65 : vector<4x256xf32>
    %67 = arith.truncf %66 : vector<4x256xf32> to vector<4x256xbf16>
    %cst_18 = arith.constant 0.000000e+00 : bf16
    %68 = vector.broadcast %cst_18 : bf16 to vector<4x17xbf16>
    %69 = tpu.concatenate %68, %67, %68 in 1 : vector<4x17xbf16>, vector<4x256xbf16>, vector<4x17xbf16> -> vector<4x290xbf16>
    %70 = vector.extract_strided_slice %69 {offsets = [0, 0], sizes = [4, 256], strides = [1, 1]} : vector<4x290xbf16> to vector<4x256xbf16>
    %c1_i32_19 = arith.constant 1 : i32
    %71 = vector.broadcast %c1_i32_19 : i32 to vector<1x256xi32>
    %72 = arith.cmpi sge, %2, %71 : vector<1x256xi32>
    %c0_i32_20 = arith.constant 0 : i32
    %73 = arith.sitofp %c0_i32_20 : i32 to bf16
    %74 = vector.shape_cast %72 : vector<1x256xi1> to vector<1x256xi1>
    %75 = vector.broadcast %74 : vector<1x256xi1> to vector<4x256xi1>
    %76 = vector.broadcast %73 : bf16 to vector<4x256xbf16>
    %77 = arith.select %75, %70, %76 : vector<4x256xi1>, vector<4x256xbf16>
    %78 = vector.extract_strided_slice %69 {offsets = [0, 1], sizes = [4, 256], strides = [1, 1]} : vector<4x290xbf16> to vector<4x256xbf16>
    %79 = vector.extract_strided_slice %69 {offsets = [0, 2], sizes = [4, 256], strides = [1, 1]} : vector<4x290xbf16> to vector<4x256xbf16>
    %c15_i32_21 = arith.constant 15 : i32
    %80 = vector.broadcast %c15_i32_21 : i32 to vector<1x256xi32>
    %81 = arith.cmpi slt, %2, %80 : vector<1x256xi32>
    %c0_i32_22 = arith.constant 0 : i32
    %82 = arith.sitofp %c0_i32_22 : i32 to bf16
    %83 = vector.shape_cast %81 : vector<1x256xi1> to vector<1x256xi1>
    %84 = vector.broadcast %83 : vector<1x256xi1> to vector<4x256xi1>
    %85 = vector.broadcast %82 : bf16 to vector<4x256xbf16>
    %86 = arith.select %84, %79, %85 : vector<4x256xi1>, vector<4x256xbf16>
    %87 = vector.extract_strided_slice %69 {offsets = [0, 16], sizes = [4, 256], strides = [1, 1]} : vector<4x290xbf16> to vector<4x256xbf16>
    %c1_i32_23 = arith.constant 1 : i32
    %88 = vector.broadcast %c1_i32_23 : i32 to vector<1x256xi32>
    %89 = arith.cmpi sge, %2, %88 : vector<1x256xi32>
    %c0_i32_24 = arith.constant 0 : i32
    %90 = arith.sitofp %c0_i32_24 : i32 to bf16
    %91 = vector.shape_cast %89 : vector<1x256xi1> to vector<1x256xi1>
    %92 = vector.broadcast %91 : vector<1x256xi1> to vector<4x256xi1>
    %93 = vector.broadcast %90 : bf16 to vector<4x256xbf16>
    %94 = arith.select %92, %87, %93 : vector<4x256xi1>, vector<4x256xbf16>
    %95 = vector.extract_strided_slice %69 {offsets = [0, 17], sizes = [4, 256], strides = [1, 1]} : vector<4x290xbf16> to vector<4x256xbf16>
    %96 = vector.extract_strided_slice %69 {offsets = [0, 18], sizes = [4, 256], strides = [1, 1]} : vector<4x290xbf16> to vector<4x256xbf16>
    %c15_i32_25 = arith.constant 15 : i32
    %97 = vector.broadcast %c15_i32_25 : i32 to vector<1x256xi32>
    %98 = arith.cmpi slt, %2, %97 : vector<1x256xi32>
    %c0_i32_26 = arith.constant 0 : i32
    %99 = arith.sitofp %c0_i32_26 : i32 to bf16
    %100 = vector.shape_cast %98 : vector<1x256xi1> to vector<1x256xi1>
    %101 = vector.broadcast %100 : vector<1x256xi1> to vector<4x256xi1>
    %102 = vector.broadcast %99 : bf16 to vector<4x256xbf16>
    %103 = arith.select %101, %96, %102 : vector<4x256xi1>, vector<4x256xbf16>
    %104 = vector.extract_strided_slice %69 {offsets = [0, 32], sizes = [4, 256], strides = [1, 1]} : vector<4x290xbf16> to vector<4x256xbf16>
    %c1_i32_27 = arith.constant 1 : i32
    %105 = vector.broadcast %c1_i32_27 : i32 to vector<1x256xi32>
    %106 = arith.cmpi sge, %2, %105 : vector<1x256xi32>
    %c0_i32_28 = arith.constant 0 : i32
    %107 = arith.sitofp %c0_i32_28 : i32 to bf16
    %108 = vector.shape_cast %106 : vector<1x256xi1> to vector<1x256xi1>
    %109 = vector.broadcast %108 : vector<1x256xi1> to vector<4x256xi1>
    %110 = vector.broadcast %107 : bf16 to vector<4x256xbf16>
    %111 = arith.select %109, %104, %110 : vector<4x256xi1>, vector<4x256xbf16>
    %112 = vector.extract_strided_slice %69 {offsets = [0, 33], sizes = [4, 256], strides = [1, 1]} : vector<4x290xbf16> to vector<4x256xbf16>
    %113 = vector.extract_strided_slice %69 {offsets = [0, 34], sizes = [4, 256], strides = [1, 1]} : vector<4x290xbf16> to vector<4x256xbf16>
    %c15_i32_29 = arith.constant 15 : i32
    %114 = vector.broadcast %c15_i32_29 : i32 to vector<1x256xi32>
    %115 = arith.cmpi slt, %2, %114 : vector<1x256xi32>
    %c0_i32_30 = arith.constant 0 : i32
    %116 = arith.sitofp %c0_i32_30 : i32 to bf16
    %117 = vector.shape_cast %115 : vector<1x256xi1> to vector<1x256xi1>
    %118 = vector.broadcast %117 : vector<1x256xi1> to vector<4x256xi1>
    %119 = vector.broadcast %116 : bf16 to vector<4x256xbf16>
    %120 = arith.select %118, %113, %119 : vector<4x256xi1>, vector<4x256xbf16>
    %121 = tpu.concatenate %77, %78, %86, %94, %95, %103, %111, %112, %120 in 0 : vector<4x256xbf16>, vector<4x256xbf16>, vector<4x256xbf16>, vector<4x256xbf16>, vector<4x256xbf16>, vector<4x256xbf16>, vector<4x256xbf16>, vector<4x256xbf16>, vector<4x256xbf16> -> vector<36x256xbf16>
    %c0_31 = arith.constant 0 : index
    %c0_32 = arith.constant 0 : index
    %122 = vector.load %arg4[%c0_31, %c0_32] : memref<4x36xbf16, #tpu.memory_space<vmem>>, vector<4x36xbf16>
    %cst_33 = arith.constant dense<0.000000e+00> : vector<4x256xf32>
    %123 = tpu.matmul %122, %121, %cst_33 {dimension_numbers = #tpu.dot_dimension_numbers<[1], [0], [0], [1], [0, 0, 1, 1], [], []>} : vector<4x36xbf16>, vector<36x256xbf16>, vector<4x256xf32> -> vector<4x256xf32>
    %c0_34 = arith.constant 0 : index
    %c0_35 = arith.constant 0 : index
    %124 = vector.load %arg5[%c0_34, %c0_35] : memref<4x1xf32, #tpu.memory_space<vmem>>, vector<4x1xf32>
    %125 = vector.broadcast %124 : vector<4x1xf32> to vector<4x256xf32>
    %126 = arith.addf %123, %125 : vector<4x256xf32>
    %127 = vector.shape_cast %3 : vector<1x4x256xf32> to vector<4x256xf32>
    %128 = arith.addf %126, %127 : vector<4x256xf32>
    %cst_36 = arith.constant 0.000000e+00 : f32
    %129 = vector.broadcast %cst_36 : f32 to vector<4x256xf32>
    %130 = arith.maximumf %128, %129 : vector<4x256xf32>
    %c0_37 = arith.constant 0 : index
    %c0_38 = arith.constant 0 : index
    %c0_39 = arith.constant 0 : index
    %131 = vector.load %arg6[%c0_37, %c0_38, %c0_39] : memref<1x4x256xf32, #tpu.memory_space<vmem>>, vector<1x4x256xf32>
    %132 = vector.shape_cast %131 : vector<1x4x256xf32> to vector<4x256xf32>
    %133 = vector.shape_cast %130 : vector<4x256xf32> to vector<1x4x256xf32>
    tpu.vector_store %arg6[%c0_37, %c0_38, %c0_39], %133 {strides = array<i32>} : memref<1x4x256xf32, #tpu.memory_space<vmem>>, vector<1x4x256xf32>,
    return
  }
  func.func @transform_0(%arg0: i32) -> (i32, i32, i32) {
    %c0_i32 = arith.constant 0 : i32
    %c0_i32_0 = arith.constant 0 : i32
    %c0_i32_1 = arith.constant 0 : i32
    return %arg0, %c0_i32, %c0_i32_0 : i32, i32, i32
  }
  func.func @transform_1(%arg0: i32) -> (i32, i32) {
    %c0_i32 = arith.constant 0 : i32
    %c0_i32_0 = arith.constant 0 : i32
    %c0_i32_1 = arith.constant 0 : i32
    return %c0_i32, %c0_i32_0 : i32, i32
  }
  func.func @transform_2(%arg0: i32) -> (i32, i32) {
    %c0_i32 = arith.constant 0 : i32
    %c0_i32_0 = arith.constant 0 : i32
    %c0_i32_1 = arith.constant 0 : i32
    return %c0_i32, %c0_i32_0 : i32, i32
  }
  func.func @transform_3(%arg0: i32) -> (i32, i32) {
    %c0_i32 = arith.constant 0 : i32
    %c0_i32_0 = arith.constant 0 : i32
    %c0_i32_1 = arith.constant 0 : i32
    return %c0_i32, %c0_i32_0 : i32, i32
  }
  func.func @transform_4(%arg0: i32) -> (i32, i32) {
    %c0_i32 = arith.constant 0 : i32
    %c0_i32_0 = arith.constant 0 : i32
    %c0_i32_1 = arith.constant 0 : i32
    return %c0_i32, %c0_i32_0 : i32, i32
  }
  func.func @transform_5(%arg0: i32) -> (i32, i32, i32) {
    %c0_i32 = arith.constant 0 : i32
    %c0_i32_0 = arith.constant 0 : i32
    %c0_i32_1 = arith.constant 0 : i32
    return %arg0, %c0_i32, %c0_i32_0 : i32, i32, i32
  }
}

</mosaic_0001>

<bundles_post_ra>
// kernel: residual_block.1
= control target key start
LH: loop header
LB: loop body
LE: loop exit
PB: predicated region body
PF: predicated region fallthrough
CT: control target
= control target key end

     0   :  { %s934_s18 = smov 0   ;;  %s1289_s0 = inlined_call_operand.vmem [shape: f32[2,4,256], index: 0, kind: input, shape index: {}]   ;;  %s1290_s1 = inlined_call_operand.vmem [shape: bf16[4,36], index: 1, kind: input, shape index: {}]   ;;  %s1291_s2 = inlined_call_operand.vmem [shape: f32[4,1], index: 2, kind: input, shape index: {}]   ;;  %s1292_s3 = inlined_call_operand.vmem [shape: bf16[4,36], index: 3, kind: input, shape index: {}]   ;;  %s1293_s4 = inlined_call_operand.vmem [shape: f32[4,1], index: 4, kind: input, shape index: {}]   ;;  %s1294_s5 = inlined_call_operand.vmem [shape: f32[2,4,256], index: 5, kind: output, shape index: {}]  }
   0x1 LB: > { %s839_s19 = sadd.s32 4294967295, %s887_s18   ;;  %p843_p0 = scmp.ge.s32.totalorder %s887_s18, 1  ;;  %s887_s18 = sphi %s934_s18, %s15_s18  }
   0x2   : > { %p187_p1 = scmp.lt.s32.totalorder %s887_s18, 3 }
   0x4   : > { %p188_p2 = pnand %p843_p0, %p187_p1 }
   0x5   : > { %p215_p3 = scmp.lt.s32.totalorder (!%p188_p2), %s839_s19, 1  ;;  %s890_s24 = smov (!%p188_p2), 17  }
   0x6   : > { %191 = sbr.rel (%p188_p2) target bundleno = 987 (0x3db), region = 40  ;;  %s891_s25 = smov (!%p188_p2), 18  }
   0x7   : > { %s892_s26 = smov (!%p188_p2), 32   ;;  %s893_s27 = smov (!%p188_p2), 34  }
   0x8   : > { %s894_s28 = smov (!%p188_p2), 2   ;;  %s895_s29 = smov (!%p188_p2), 16  }
   0x9   : > { %s896_s30 = smov (!%p188_p2), 111   ;;  %s897_s6 = smov (!%p188_p2), 95  }
   0xa   : > { %s898_s7 = smov (!%p188_p2), 127   ;;  %s899_s8 = smov (!%p188_p2), 94  }
   0xb   : > { %v228_v0 = vlaneseq  ;;  %v889_v1 = vmov 0   ;;  %s1329_s19 = smov (!%p215_p3, %s839_s19), 1  ;;  %vm245_vm6 = vcmask 138240   ;;  %vm344_vm7 = vcmask 277504   ;;  %s900_s9 = smov 96  }
   0xc   : > { %543 = vmatprep.mubr.bf16.mxu0 %v889_v1  ;;  %879 = vset.pattern.permute.xlu0 %v889_v1  ;;  %s854_s20 = sshll.u32 %s1329_s19, 3  ;;  %vm320_vm11 = vcmask 146432   ;;  %vm332_vm15 = vcmask 261120   ;;  %s901_s10 = smov 110  }
   0xd   : > { %v229_v2 = vand.u32 127, %v228_v0  ;;  %766 = vmatprep.mubr.bf16.mxu1 %v889_v1  ;;  %v265_v3 = vshrl.u32 %v228_v0, 7  ;;  %s219_s23 = scalar_lea.vmem %s1289_s0, %s854_s20  ;;  %s902_s11 = smov 126  }
   0xe   : > { %v950_v6 = vld [vmem:[%s219_s23] sm:$0xff]  ;;  %s903_s12 = smov 112  }
   0xf   : > { %v230_v4 = vadd.s32 128, %v229_v2  ;;  %v231_v5 = vand.u32 15, %v229_v2  ;;  %v237_v8 = vpack.c.bf16 %v950_v6, %v950_v6  ;;  %v266_v9 = vsub.s32 0, %v265_v3 }
  0x10   : > { %v956_v10 = vcombine.high %v950_v6, %v950_v6  ;;  %v270_v12 = vsub.s32 4, %v265_v3 }
  0x11   : > { %v232_v7 = vand.u32 15, %v230_v4  ;;  %vm276_vm0 = vcmp.lt.s32.totalorder %v231_v5, 15  ;;  %vm256_vm1 = vcmp.ge.s32.totalorder %v231_v5, 1  ;;  %241 = vrot.lane.b32.xlu1 %v237_v8, %s890_s24 }
  0x12   : > { %v238_v11 = vpack.c.bf16 %v956_v10, %v956_v10 }
  0x13   : > { %vm277_vm2 = vcmp.lt.s32.totalorder %v232_v7, 15  ;;  %vm257_vm3 = vcmp.ge.s32.totalorder %v232_v7, 1 }
  0x14   : > { %vm282_vm4 = vmpackc.low %vm277_vm2, %vm276_vm0  ;;  %vm308_vm2 = vcmask 130048  }
  0x15   : > { %v283_v13 = vsel %vm282_vm4, 65537, %v889_v1  ;;  %vm262_vm5 = vmpackc.low %vm257_vm3, %vm256_vm1  ;;  %243 = vrot.lane.b32.xlu1 %v238_v11, %s890_s24 }
  0x16   : > { %v287_v14 = vrot.slane %v283_v13, %v266_v9  ;;  %v263_v15 = vsel %vm262_vm5, 65537, %v889_v1  ;;  %v291_v16 = vrot.slane %v283_v13, %v270_v12  ;;  %vm296_vm5 = vcmask 15360  }
  0x17   : > { %v962_v17 = vrot.slane %v263_v15, %v270_v12  ;;  %v965_v18 = vrot.slane %v263_v15, %v266_v9  ;;  %v495_v9 = vld [vmem:[%s1291_s2] sm:$0xf] }
  0x18   : > { %316 = vrot.lane.b32.xlu0 %v287_v14, %s891_s25 }
  0x19   : > { %330 = vrot.lane.b32.xlu1 %v962_v17, %s892_s26 }
  0x1c   : > { %318 = vrot.lane.b32.xlu0 %v291_v16, %s891_s25 }
  0x1d   : > { %342 = vrot.lane.b32.xlu1 %v291_v16, %s893_s27 }
  0x20   : > { %328 = vrot.lane.b32.xlu0 %v965_v18, %s892_s26  ;;  %s224_s26 = scalar_lea.vmem %s1294_s5, %s854_s20 }
  0x21   : > { %294 = vrot.lane.b32.xlu1 %v291_v16, %s894_s28 }
  0x24   : > { %340 = vrot.lane.b32.xlu0 %v287_v14, %s893_s27 }
  0x25   : > { %306 = vrot.lane.b32.xlu1 %v962_v17, %s895_s29 }
  0x28   : > { %292 = vrot.lane.b32.xlu0 %v287_v14, %s894_s28 }
  0x2c   : > { %304 = vrot.lane.b32.xlu0 %v965_v18, %s895_s29 }
  0x83   : > { %v242_v19 = vpop.permute.xlu1 %241 }
  0x84   : > { %v971_v20 = vsel %vm245_vm6, 0, %v242_v19 }
  0x85   : > { %396 = vrot.lane.b32.xlu1 %v971_v20, %s896_s30  ;;  %v435_v27 = vrot.slane %v971_v20, 2  ;;  %v354_v28 = vrot.slane %v971_v20, 6 }
  0x87   : > { %v244_v22 = vpop.permute.xlu1 %243 }
  0x88   : > { %v978_v23 = vsel %vm245_vm6, %v242_v19, %v244_v22  ;;  %v981_v24 = vsel %vm245_vm6, %v244_v22, 0 }
  0x89   : > { %400 = vrot.lane.b32.xlu0 %v981_v24, %s896_s30  ;;  %398 = vrot.lane.b32.xlu1 %v978_v23, %s896_s30  ;;  %v437_v30 = vrot.slane %v981_v24, 2  ;;  %v436_v31 = vrot.slane %v978_v23, 2  ;;  %v356_v34 = vrot.slane %v981_v24, 6  ;;  %v355_v35 = vrot.slane %v978_v23, 6 }
  0x8a   : > { %v975_v21 = vpop.permute.xlu0 %316 }
  0x8b   : > { %v989_v26 = vpop.permute.xlu1 %330  ;;  %vm322_vm0 = vcmp.ne.s16.totalorder %v975_v21, 0 }
  0x8c   : > { %v325_v51 = vsel %vm322_vm0, %v971_v20, 0  ;;  %vm1299_vm3 = vcmp.ne.s16.totalorder %v989_v26, 0 }
  0x8d   : > { %438 = vrot.lane.b32.xlu0 %v435_v27, %s897_s6  ;;  %357 = vrot.lane.b32.xlu1 %v354_v28, %s898_s7  ;;  %v408_v55 = vrot.slane %v325_v51, 6  ;;  %v339_v57 = vsel %vm1299_vm3, %v981_v24, 0  ;;  %vm1305_vm3 = vcmask 785408  }
  0x8e   : > { %v987_v25 = vpop.permute.xlu0 %318  ;;  %v425_v60 = vrot.slane %v339_v57, 4 }
  0x8f   : > { %v999_v32 = vpop.permute.xlu1 %342  ;;  %vm1301_vm12 = vcmp.ne.s16.totalorder %v987_v25, 0  ;;  %v1036_v42 = vsel %vm320_vm11, %v975_v21, %v987_v25 }
  0x90   : > { %vm348_vm13 = vcmp.ne.s16.totalorder %v999_v32, 0  ;;  %v327_v44 = vsel %vm1301_vm12, %v981_v24, 0  ;;  %vm323_vm1 = vcmp.ne.s16.totalorder %v1036_v42, 0  ;;  %vm466_vm12 = vcmask 1043456  }
  0x91   : > { %442 = vrot.lane.b32.xlu1 %v437_v30, %s897_s6  ;;  %440 = vrot.lane.b32.xlu0 %v436_v31, %s897_s6  ;;  %v351_v46 = vsel %vm348_vm13, %v981_v24, 0  ;;  %v410_v48 = vrot.slane %v327_v44, 6  ;;  %v326_v52 = vsel %vm323_vm1, %v978_v23, 0 }
  0x92   : > { %v995_v29 = vpop.permute.xlu0 %328  ;;  %v409_v56 = vrot.slane %v326_v52, 6 }
  0x93   : > { %vm334_vm8 = vcmp.ne.s16.totalorder %v995_v29, 0  ;;  %v1016_v37 = vpop.permute.xlu1 %294  ;;  %v1053_v47 = vsel %vm332_vm15, %v995_v29, %v989_v26 }
  0x94   : > { %v337_v38 = vsel %vm334_vm8, %v971_v20, 0  ;;  %vm1300_vm14 = vcmp.ne.s16.totalorder %v1016_v37, 0  ;;  %vm1306_vm4 = vcmp.ne.s16.totalorder %v1053_v47, 0 }
  0x95   : > { %361 = vrot.lane.b32.xlu0 %v356_v34, %s898_s7  ;;  %359 = vrot.lane.b32.xlu1 %v355_v35, %s898_s7  ;;  %v423_v43 = vrot.slane %v337_v38, 4  ;;  %v303_v45 = vsel %vm1300_vm14, %v981_v24, 0  ;;  %v338_v58 = vsel %vm1306_vm4, %v978_v23, 0  ;;  %vm1307_vm14 = vcmask 777216  }
  0x96   : > { %v1003_v33 = vpop.permute.xlu0 %340  ;;  %v371_v49 = vrot.slane %v303_v45, 4  ;;  %v424_v61 = vrot.slane %v338_v58, 4  ;;  %vm273_vm4 = vcmp.ne.s16.totalorder %v962_v17, 0 }
  0x97   : > { %v1009_v36 = vsel %vm344_vm7, %v1003_v33, %v999_v32  ;;  %vm346_vm9 = vcmp.ne.s16.totalorder %v1003_v33, 0  ;;  %v1065_v53 = vpop.permute.xlu1 %306 }
  0x98   : > { %vm347_vm10 = vcmp.ne.s16.totalorder %v1009_v36, 0  ;;  %v349_v39 = vsel %vm346_vm9, %v971_v20, 0 }
  0x99   : > { %v350_v40 = vsel %vm347_vm10, %v978_v23, 0  ;;  %450 = vrot.lane.b32.xlu0 %v349_v39, %s899_s8 }
  0x9a   : > { %v1030_v41 = vpop.permute.xlu0 %292  ;;  %452 = vrot.lane.b32.xlu1 %v350_v40, %s899_s8 }
  0x9b   : > { %vm298_vm7 = vcmp.ne.s16.totalorder %v1030_v41, 0  ;;  %v1085_v59 = vsel %vm296_vm5, %v1030_v41, %v1016_v37  ;;  %vm1295_vm5 = vcmp.ne.s16.totalorder %v1065_v53, 0 }
  0x9c   : > { %v301_v62 = vsel %vm298_vm7, %v971_v20, 0  ;;  %vm1297_vm15 = vcmp.ne.s16.totalorder %v1085_v59, 0  ;;  %v315_v7 = vsel %vm1295_vm5, %v981_v24, 0  ;;  %vm1302_vm5 = vcmask 769024  }
  0x9d   : > { %454 = vrot.lane.b32.xlu0 %v351_v46, %s899_s8  ;;  %v369_v0 = vrot.slane %v301_v62, 4  ;;  %v302_v2 = vsel %vm1297_vm15, %v978_v23, 0  ;;  %v386_v8 = vrot.slane %v315_v7, 2  ;;  %vm1304_vm15 = vcmask 900096  }
  0x9e   : > { %426 = vrot.lane.b32.xlu1 %v423_v43, %s900_s9  ;;  %v1055_v50 = vpop.permute.xlu0 %304  ;;  %v370_v4 = vrot.slane %v302_v2, 4 }
  0x9f   : > { %v1071_v54 = vsel %vm308_vm2, %v1055_v50, %v1065_v53  ;;  %vm1296_vm2 = vcmp.ne.s16.totalorder %v1055_v50, 0 }
  0xa0   : > { %vm1298_vm11 = vcmp.ne.s16.totalorder %v1071_v54, 0  ;;  %v313_v3 = vsel %vm1296_vm2, %v971_v20, 0  ;;  %vm459_vm2 = vcmask 1041408  }
  0xa1   : > { %415 = vrot.lane.b32.xlu0 %v410_v48, %s901_s10  ;;  %v314_v63 = vsel %vm1298_vm11, %v978_v23, 0  ;;  %v384_v5 = vrot.slane %v313_v3, 2  ;;  %vm1303_vm11 = vcmask 908288  }
  0xa2   : > { %376 = vrot.lane.b32.xlu1 %v371_v49, %s902_s11  ;;  %v385_v1 = vrot.slane %v314_v63, 2 }
  0xa5   : > { %411 = vrot.lane.b32.xlu0 %v408_v55, %s901_s10 }
  0xa6   : > { %413 = vrot.lane.b32.xlu1 %v409_v56, %s901_s10 }
  0xa9   : > { %430 = vrot.lane.b32.xlu0 %v425_v60, %s900_s9 }
  0xaa   : > { %428 = vrot.lane.b32.xlu1 %v424_v61, %s900_s9 }
  0xad   : > { %372 = vrot.lane.b32.xlu0 %v369_v0, %s902_s11 }
  0xae   : > { %389 = vrot.lane.b32.xlu1 %v385_v1, %s903_s12 }
  0xb1   : > { %374 = vrot.lane.b32.xlu0 %v370_v4, %s902_s11 }
  0xb2   : > { %387 = vrot.lane.b32.xlu1 %v384_v5, %s903_s12 }
  0xb5   : > { %391 = vrot.lane.b32.xlu0 %v386_v8, %s903_s12 }
  0xb9   : > { %498 = vperm.xlu0 %879, %v495_v9  }
  0xf7   : > { %v397_v11 = vpop.permute.xlu1 %396 }
  0xfb   : > { %v401_v12 = vpop.permute.xlu0 %400  ;;  %v399_v13 = vpop.permute.xlu1 %398 }
  0xfc   : > { %v403_v48 = vsel %vm1303_vm11, %v397_v11, %v399_v13  ;;  %v404_v49 = vsel %vm1303_vm11, %v399_v13, %v401_v12  ;;  %vm363_vm11 = vcmask 1039360   ;;  %v275_v13 = vsel %vm273_vm4, %v978_v23, 0  ;;  %v494_v23 = vld [vmem:[%s1290_s1] sm:$0x3] }
  0xff   : > { %v439_v14 = vpop.permute.xlu0 %438  ;;  %v358_v15 = vpop.permute.xlu1 %357 }
 0x103   : > { %v441_v16 = vpop.permute.xlu0 %440  ;;  %v443_v19 = vpop.permute.xlu1 %442 }
 0x104   : > { %v445_v60 = vsel %vm1307_vm14, %v439_v14, %v441_v16  ;;  %v446_v61 = vsel %vm1307_vm14, %v441_v16, %v443_v19  ;;  %vm393_vm14 = vcmask 916480  }
 0x107   : > { %v362_v22 = vpop.permute.xlu0 %361  ;;  %v360_v24 = vpop.permute.xlu1 %359 }
 0x108   : > { %v364_v4 = vsel %vm363_vm11, %v358_v15, %v360_v24  ;;  %v365_v7 = vsel %vm363_vm11, %v360_v24, %v362_v22 }
 0x109   : > { %v465_v15 = vsel %vm459_vm2, %v275_v13, %v365_v7 }
 0x10b   : > { %v451_v27 = vpop.permute.xlu0 %450 }
 0x10c   : > { %v453_v28 = vpop.permute.xlu1 %452 }
 0x10d   : > { %v457_v30 = vsel %vm1302_vm5, %v451_v27, %v453_v28 }
 0x10e   : > { %v506_v38 = vsel %vm459_vm2, %v457_v30, 0 }
 0x10f   : > { %v455_v31 = vpop.permute.xlu0 %454 }
 0x110   : > { %v427_v34 = vpop.permute.xlu1 %426  ;;  %v458_v35 = vsel %vm1302_vm5, %v453_v28, %v455_v31  ;;  %vm471_vm5 = vcmask 1045504  }
 0x111   : > { %848 = vmatprep.subr.msk.bf16.mxu0 %vm459_vm2, %v458_v35 }
 0x112   : > { %522 = vmatpush1.bf16.msra.mxu0 %v506_v38 }
 0x113   : > { %v416_v39 = vpop.permute.xlu0 %415 }
 0x114   : > { %v377_v40 = vpop.permute.xlu1 %376 }
 0x117   : > { %v412_v43 = vpop.permute.xlu0 %411 }
 0x118   : > { %v414_v44 = vpop.permute.xlu1 %413 }
 0x119   : > { %v418_v45 = vsel %vm1304_vm15, %v412_v43, %v414_v44  ;;  %v419_v46 = vsel %vm1304_vm15, %v414_v44, %v416_v39  ;;  %vm378_vm15 = vcmask 1031168  }
 0x11a   : > { %v480_v55 = vsel %vm459_vm2, %v403_v48, %v418_v45  ;;  %v483_v56 = vsel %vm459_vm2, %v404_v49, %v419_v46 }
 0x11b   : > { %v431_v51 = vpop.permute.xlu0 %430 }
 0x11c   : > { %v429_v52 = vpop.permute.xlu1 %428 }
 0x11d   : > { %v433_v57 = vsel %vm1305_vm3, %v427_v34, %v429_v52  ;;  %v434_v58 = vsel %vm1305_vm3, %v429_v52, %v431_v51  ;;  %vm1308_vm3 = vcmp.ne.s16.totalorder %v965_v18, 0 }
 0x11e   : > { %v487_v62 = vsel %vm466_vm12, %v483_v56, %v434_v58  ;;  %v485_v63 = vsel %vm466_vm12, %v480_v55, %v433_v57  ;;  %v274_v11 = vsel %vm1308_vm3, %v971_v20, 0  ;;  %vm501_vm3 = vcmask 293888  }
 0x11f   : > { %v492_v0 = vsel %vm471_vm5, %v487_v62, %v446_v61  ;;  %v489_v1 = vsel %vm471_vm5, %v485_v63, %v445_v60  ;;  %v373_v2 = vpop.permute.xlu0 %372  ;;  %v462_v14 = vsel %vm459_vm2, %v274_v11, %v364_v4 }
 0x120   : > { %523 = vmatprep.subr.bf16.mxu0 %v492_v0  ;;  %v390_v3 = vpop.permute.xlu1 %389 }
 0x121   : > { %524 = vmatpush1.bf16.msra.mxu0 %v489_v1 }
 0x123   : > { %v375_v5 = vpop.permute.xlu0 %374 }
 0x124   : > { %v379_v8 = vsel %vm378_vm15, %v373_v2, %v375_v5  ;;  %v388_v9 = vpop.permute.xlu1 %387  ;;  %v380_v12 = vsel %vm378_vm15, %v375_v5, %v377_v40 }
 0x125   : > { %v394_v16 = vsel %vm393_vm14, %v388_v9, %v390_v3  ;;  %v468_v22 = vsel %vm466_vm12, %v462_v14, %v379_v8  ;;  %v470_v27 = vsel %vm466_vm12, %v465_v15, %v380_v12 }
 0x126   : > { %v473_v28 = vsel %vm471_vm5, %v468_v22, %v394_v16 }
 0x127   : > { %v392_v19 = vpop.permute.xlu0 %391 }
 0x128   : > { %v395_v24 = vsel %vm393_vm14, %v390_v3, %v392_v19 }
 0x129   : > { %v476_v20 = vsel %vm471_vm5, %v470_v27, %v395_v24 }
 0x12a   : > { %525 = vmatprep.subr.bf16.mxu0 %v476_v20 }
 0x12b   : > { %526 = vmatpush1.bf16.msra.mxu0 %v473_v28 }
 0x12e   : > { %849 = vmatmul.mubr.msk.bf16.vlgmr.msra.gmra.mxu0 %vm501_vm3, %v494_v23 }
 0x134   : > { %v499_v30 = vpop.permute.xlu0 %498 }
 0x1ee   : > { %v545_v31 = vpop.f32.mrf.mxu0 }
 0x1ef   : > { %v546_v34 = vadd.f32 %v545_v31, %v499_v30 }
 0x1f0   : > { %v547_v35 = vpop.f32.mrf.mxu0 }
 0x1f1   : > { %v552_v38 = vmax.f32 %v546_v34, 0.0  ;;  %v548_v39 = vadd.f32 %v547_v35, %v499_v30 }
 0x1f2   : > { %v549_v40 = vpop.f32.mrf.mxu0 }
 0x1f3   : > { %v554_v43 = vpack.c.bf16 %v552_v38, %v552_v38  ;;  %v553_v44 = vmax.f32 %v548_v39, 0.0 }
 0x1f4   : > { %v550_v45 = vpop.f32.mrf.mxu0 }
 0x1f5   : > { %558 = vrot.lane.b32.xlu1 %v554_v43, %s890_s24  ;;  %v555_v46 = vpack.c.bf16 %v553_v44, %v553_v44 }
 0x1f9   : > { %560 = vrot.lane.b32.xlu1 %v555_v46, %s890_s24 }
 0x267   : > { %v559_v48 = vpop.permute.xlu1 %558 }
 0x268   : > { %v1160_v49 = vsel %vm245_vm6, 0, %v559_v48 }
 0x269   : > { %628 = vrot.lane.b32.xlu1 %v1160_v49, %s896_s30  ;;  %v584_v51 = vsel %vm346_vm9, %v1160_v49, 0  ;;  %v589_v57 = vrot.slane %v1160_v49, 6  ;;  %v664_v58 = vrot.slane %v1160_v49, 2  ;;  %v581_v60 = vsel %vm334_vm8, %v1160_v49, 0 }
 0x26a   : > { %678 = vrot.lane.b32.xlu0 %v584_v51, %s899_s8  ;;  %v578_v62 = vsel %vm322_vm0, %v1160_v49, 0  ;;  %v653_v63 = vrot.slane %v581_v60, 4  ;;  %v572_v29 = vsel %vm298_vm7, %v1160_v49, 0  ;;  %vm1310_vm8 = vcmp.ne.s16.totalorder %v987_v25, 0 }
 0x26b   : > { %v561_v52 = vpop.permute.xlu1 %560  ;;  %v639_v0 = vrot.slane %v578_v62, 6  ;;  %v603_v1 = vrot.slane %v572_v29, 4  ;;  %vm1311_vm9 = vcmp.ne.s16.totalorder %v1016_v37, 0  ;;  %vm1314_vm0 = vcmp.ne.s16.totalorder %v1085_v59, 0  ;;  %v719_v59 = vld [vmem:[%s1293_s4] sm:$0xf] }
 0x26c   : > { %v1169_v55 = vsel %vm245_vm6, %v559_v48, %v561_v52  ;;  %v568_v56 = vsel %vm245_vm6, %v561_v52, 0  ;;  %vm1309_vm6 = vcmp.ne.s16.totalorder %v1053_v47, 0  ;;  %vm1316_vm7 = vcmp.ne.s16.totalorder %v1065_v53, 0 }
 0x26d   : > { %630 = vrot.lane.b32.xlu1 %v1169_v55, %s896_s30  ;;  %v585_v33 = vsel %vm347_vm10, %v1169_v55, 0  ;;  %v586_v61 = vsel %vm348_vm13, %v568_v56, 0  ;;  %v666_v36 = vrot.slane %v568_v56, 2  ;;  %v590_v21 = vrot.slane %v1169_v55, 6 }
 0x26e   : > { %632 = vrot.lane.b32.xlu0 %v568_v56, %s896_s30  ;;  %v665_v32 = vrot.slane %v1169_v55, 2  ;;  %v579_v2 = vsel %vm323_vm1, %v1169_v55, 0  ;;  %v591_v3 = vrot.slane %v568_v56, 6  ;;  %v582_v4 = vsel %vm1309_vm6, %v1169_v55, 0 }
 0x26f   : > { %v640_v41 = vrot.slane %v579_v2, 6  ;;  %v580_v5 = vsel %vm1310_vm8, %v568_v56, 0  ;;  %v654_v7 = vrot.slane %v582_v4, 4  ;;  %v574_v8 = vsel %vm1311_vm9, %v568_v56, 0 }
 0x270   : > { %v641_v42 = vrot.slane %v580_v5, 6  ;;  %vm1312_vm10 = vcmp.ne.s16.totalorder %v989_v26, 0  ;;  %v605_v47 = vrot.slane %v574_v8, 4  ;;  %vm1313_vm13 = vcmp.ne.s16.totalorder %v1071_v54, 0 }
 0x271   : > { %592 = vrot.lane.b32.xlu1 %v589_v57, %s898_s7  ;;  %v583_v9 = vsel %vm1312_vm10, %v568_v56, 0  ;;  %v576_v25 = vsel %vm1313_vm13, %v1169_v55, 0  ;;  %v573_v37 = vsel %vm1314_vm0, %v1169_v55, 0  ;;  %vm1315_vm1 = vcmp.ne.s16.totalorder %v1055_v50, 0 }
 0x272   : > { %667 = vrot.lane.b32.xlu0 %v664_v58, %s897_s6  ;;  %v655_v11 = vrot.slane %v583_v9, 4  ;;  %v618_v12 = vrot.slane %v576_v25, 2  ;;  %v604_v13 = vrot.slane %v573_v37, 4  ;;  %v575_v26 = vsel %vm1315_vm1, %v1160_v49, 0 }
 0x273   : > { %v577_v54 = vsel %vm1316_vm7, %v568_v56, 0  ;;  %v617_v14 = vrot.slane %v575_v26, 2  ;;  %vm1317_vm6 = vcmask 769024   ;;  %vm1319_vm9 = vcmask 900096  }
 0x274   : > { %v619_v15 = vrot.slane %v577_v54, 2  ;;  %vm1318_vm8 = vmmov %vm1317_vm6  ;;  %vm1320_vm10 = vcmask 785408   ;;  %vm1322_vm0 = vcmask 908288   ;;  %v571_v5 = vsel %vm273_vm4, %v1169_v55, 0 }
 0x275   : > { %680 = vrot.lane.b32.xlu1 %v585_v33, %s899_s8  ;;  %vm1321_vm13 = vmmov %vm1319_vm9 }
 0x276   : > { %682 = vrot.lane.b32.xlu0 %v586_v61, %s899_s8  ;;  %vm1323_vm1 = vmmov %vm1322_vm0 }
 0x277   : > { %vm1324_vm7 = vmmov %vm1320_vm10 }
 0x279   : > { %656 = vrot.lane.b32.xlu1 %v653_v63, %s900_s9 }
 0x27a   : > { %642 = vrot.lane.b32.xlu0 %v639_v0, %s901_s10 }
 0x27d   : > { %671 = vrot.lane.b32.xlu1 %v666_v36, %s897_s6 }
 0x27e   : > { %606 = vrot.lane.b32.xlu0 %v603_v1, %s902_s11 }
 0x281   : > { %594 = vrot.lane.b32.xlu1 %v590_v21, %s898_s7 }
 0x282   : > { %669 = vrot.lane.b32.xlu0 %v665_v32, %s897_s6 }
 0x285   : > { %644 = vrot.lane.b32.xlu1 %v640_v41, %s901_s10 }
 0x286   : > { %596 = vrot.lane.b32.xlu0 %v591_v3, %s898_s7 }
 0x289   : > { %658 = vrot.lane.b32.xlu1 %v654_v7, %s900_s9 }
 0x28a   : > { %646 = vrot.lane.b32.xlu0 %v641_v42, %s901_s10 }
 0x28d   : > { %610 = vrot.lane.b32.xlu1 %v605_v47, %s902_s11 }
 0x28e   : > { %660 = vrot.lane.b32.xlu0 %v655_v11, %s900_s9 }
 0x291   : > { %622 = vrot.lane.b32.xlu1 %v618_v12, %s903_s12 }
 0x292   : > { %608 = vrot.lane.b32.xlu0 %v604_v13, %s902_s11 }
 0x295   : > { %620 = vrot.lane.b32.xlu1 %v617_v14, %s903_s12 }
 0x296   : > { %624 = vrot.lane.b32.xlu0 %v619_v15, %s903_s12 }
 0x29a   : > { %722 = vperm.xlu0 %879, %v719_v59  }
 0x2db   : > { %v629_v50 = vpop.permute.xlu1 %628 }
 0x2dc   : > { %v679_v16 = vpop.permute.xlu0 %678 }
 0x2df   : > { %v631_v19 = vpop.permute.xlu1 %630 }
 0x2e0   : > { %v633_v22 = vpop.permute.xlu0 %632  ;;  %v634_v56 = vsel %vm1322_vm0, %v629_v50, %v631_v19 }
 0x2e1   : > { %v635_v58 = vsel %vm1323_vm1, %v631_v19, %v633_v22 }
 0x2e3   : > { %v593_v24 = vpop.permute.xlu1 %592 }
 0x2e4   : > { %v668_v53 = vpop.permute.xlu0 %667 }
 0x2e7   : > { %v681_v27 = vpop.permute.xlu1 %680 }
 0x2e8   : > { %v683_v20 = vpop.permute.xlu0 %682  ;;  %v684_v28 = vsel %vm1317_vm6, %v679_v16, %v681_v27  ;;  %vm1325_vm6 = vcmask 777216  }
 0x2e9   : > { %v685_v23 = vsel %vm1318_vm8, %v681_v27, %v683_v20  ;;  %v729_v30 = vsel %vm459_vm2, %v684_v28, 0  ;;  %vm1326_vm8 = vmmov %vm1325_vm6 }
 0x2ea   : > { %850 = vmatprep.subr.msk.bf16.mxu1 %vm459_vm2, %v685_v23 }
 0x2eb   : > { %745 = vmatpush1.bf16.msra.mxu1 %v729_v30  ;;  %v657_v31 = vpop.permute.xlu1 %656 }
 0x2ec   : > { %v643_v34 = vpop.permute.xlu0 %642 }
 0x2ef   : > { %v672_v35 = vpop.permute.xlu1 %671 }
 0x2f0   : > { %v607_v38 = vpop.permute.xlu0 %606 }
 0x2f3   : > { %v595_v39 = vpop.permute.xlu1 %594 }
 0x2f4   : > { %v670_v40 = vpop.permute.xlu0 %669  ;;  %v598_v3 = vsel %vm363_vm11, %v593_v24, %v595_v39 }
 0x2f5   : > { %v674_v0 = vsel %vm1325_vm6, %v670_v40, %v672_v35  ;;  %v673_v36 = vsel %vm1326_vm8, %v668_v53, %v670_v40 }
 0x2f7   : > { %v645_v43 = vpop.permute.xlu1 %644 }
 0x2f8   : > { %v597_v44 = vpop.permute.xlu0 %596  ;;  %v648_v48 = vsel %vm1319_vm9, %v643_v34, %v645_v43  ;;  %vm1327_vm9 = vcmp.ne.s16.totalorder %v965_v18, 0 }
 0x2f9   : > { %v704_v33 = vsel %vm459_vm2, %v634_v56, %v648_v48  ;;  %v599_v41 = vsel %vm363_vm11, %v595_v39, %v597_v44  ;;  %v570_v8 = vsel %vm1327_vm9, %v1160_v49, 0  ;;  %v718_v49 = vld [vmem:[%s1292_s3] sm:$0x3] }
 0x2fa   : > { %v691_v9 = vsel %vm459_vm2, %v571_v5, %v599_v41  ;;  %v688_v25 = vsel %vm459_vm2, %v570_v8, %v598_v3 }
 0x2fb   : > { %v659_v45 = vpop.permute.xlu1 %658 }
 0x2fc   : > { %v647_v46 = vpop.permute.xlu0 %646  ;;  %v662_v51 = vsel %vm1320_vm10, %v657_v31, %v659_v45 }
 0x2fd   : > { %v649_v52 = vsel %vm1321_vm13, %v645_v43, %v647_v46  ;;  %v709_v63 = vsel %vm466_vm12, %v704_v33, %v662_v51 }
 0x2fe   : > { %v707_v61 = vsel %vm459_vm2, %v635_v58, %v649_v52  ;;  %v713_v2 = vsel %vm471_vm5, %v709_v63, %v673_v36 }
 0x2ff   : > { %v611_v57 = vpop.permute.xlu1 %610 }
 0x300   : > { %v661_v60 = vpop.permute.xlu0 %660 }
 0x301   : > { %v663_v62 = vsel %vm1324_vm7, %v659_v45, %v661_v60 }
 0x302   : > { %v711_v29 = vsel %vm466_vm12, %v707_v61, %v663_v62 }
 0x303   : > { %v623_v1 = vpop.permute.xlu1 %622  ;;  %v716_v21 = vsel %vm471_vm5, %v711_v29, %v674_v0 }
 0x304   : > { %v609_v32 = vpop.permute.xlu0 %608  ;;  %746 = vmatprep.subr.bf16.mxu1 %v716_v21 }
 0x305   : > { %747 = vmatpush1.bf16.msra.mxu1 %v713_v2  ;;  %v613_v4 = vsel %vm378_vm15, %v609_v32, %v611_v57  ;;  %v612_v7 = vsel %vm378_vm15, %v607_v38, %v609_v32 }
 0x306   : > { %v695_v12 = vsel %vm466_vm12, %v691_v9, %v613_v4  ;;  %v693_v55 = vsel %vm466_vm12, %v688_v25, %v612_v7 }
 0x307   : > { %v621_v42 = vpop.permute.xlu1 %620 }
 0x308   : > { %v626_v47 = vsel %vm393_vm14, %v621_v42, %v623_v1  ;;  %v625_v11 = vpop.permute.xlu0 %624 }
 0x309   : > { %v627_v37 = vsel %vm393_vm14, %v623_v1, %v625_v11  ;;  %v697_v18 = vsel %vm471_vm5, %v693_v55, %v626_v47 }
 0x30a   : > { %v700_v17 = vsel %vm471_vm5, %v695_v12, %v627_v37 }
 0x30b   : > { %748 = vmatprep.subr.bf16.mxu1 %v700_v17 }
 0x30c   : > { %749 = vmatpush1.bf16.msra.mxu1 %v697_v18 }
 0x30f   : > { %851 = vmatmul.mubr.msk.bf16.vlgmr.msra.gmra.mxu1 %vm501_vm3, %v718_v49 }
 0x315   : > { %v723_v13 = vpop.permute.xlu0 %722 }
 0x3cf   : > { %v768_v26 = vpop.f32.mrf.mxu1 }
 0x3d0   : > { %v769_v54 = vadd.f32 %v768_v26, %v723_v13 }
 0x3d1   : > { %v770_v14 = vpop.f32.mrf.mxu1 }
 0x3d2   : > { %v775_v15 = vadd.f32 %v769_v54, %v950_v6  ;;  %v771_v59 = vadd.f32 %v770_v14, %v723_v13 }
 0x3d3   : > { %v772_v50 = vpop.f32.mrf.mxu1 }
 0x3d4   : > { %v776_v16 = vadd.f32 %v771_v59, %v956_v10  ;;  %v777_v22 = vmax.f32 %v775_v15, 0.0 }
 0x3d5   : > { %v773_v19 = vpop.f32.mrf.mxu1 }
 0x3d6   : > { %v778_v24 = vmax.f32 %v776_v16, 0.0 }
 0x3d8   : > { %v781_v53 = vcombine.low %v777_v22, %v778_v24 }
 0x3da   : > { %783 = vst [vmem:[%s224_s26] sm:$0xff] %v781_v53 }
 0x3db PF: > { %s15_s18 = sadd.s32 1, %s887_s18  }
 0x3dc   : > { %p12_p4 = scmp.ge.s32.totalorder %s15_s18, 4  }
 0x3de   :  { %14 = sbr.rel (!%p12_p4) target bundleno = 1 (0x1), region = 70 }

</bundles_post_ra>
